<compile_context>
chip_gen: v5e
topology: v5e:2x2
jax: 0.10.0
libtpu: 0.0.40
codegen_flags: <defaults>
</compile_context>

<pallas_src>
import jax
import jax.numpy as jnp
from jax.experimental import pallas as pl
from jax.experimental.pallas import tpu as pltpu


def _round_up(x, m):
    return ((x + m - 1) // m) * m


def _fused_linear_kernel(x_ref, w_ref, b_ref, o_ref):
    # (TB, D) @ (D, TC) on the MXU, f32 accumulate, bias add on the VPU.
    acc = jnp.dot(x_ref[...], w_ref[...], preferred_element_type=jnp.float32)
    o_ref[...] = (acc + b_ref[...]).astype(o_ref.dtype)


def classifier_of_vocabulary(x, w1, b1, w2, b2, *, block_b=256, block_c=512):
    """x: (B, input_length); w1: (input_length, n1); b1: (n1,);
       w2: (n1, num_class); b2: (num_class,).  Returns (B, num_class)."""
    B, D = x.shape
    C = w2.shape[1]

    # Fold the two Linear layers (no activation in between) into one affine map:
    #   y = (x @ w1 + b1) @ w2 + b2 = x @ (w1 @ w2) + (b1 @ w2 + b2)
    w_eff = jnp.dot(w1, w2)                              # (D, C)
    b_eff = jnp.dot(b1[None, :], w2) + b2[None, :]       # (1, C)

    # Tile sizes: sublane-aligned row tile, lane-dense (multiple-of-128) column
    # tile so output stores are unmasked vst.
    tb = min(block_b, _round_up(B, 8))
    tc = min(block_c, _round_up(C, 128))
    B_pad = _round_up(B, tb)
    C_pad = _round_up(C, tc)

    x_p = jnp.pad(x, ((0, B_pad - B), (0, 0)))
    w_p = jnp.pad(w_eff, ((0, 0), (0, C_pad - C)))
    b_p = jnp.pad(b_eff, ((0, 0), (0, C_pad - C)))

    grid = (B_pad // tb, C_pad // tc)

    out_padded = pl.pallas_call(
        _fused_linear_kernel,
        out_shape=jax.ShapeDtypeStruct((B_pad, C_pad), x.dtype),
        grid=grid,
        in_specs=[
            pl.BlockSpec((tb, D), lambda i, j: (i, 0)),   # x rows, K resident
            pl.BlockSpec((D, tc), lambda i, j: (0, j)),   # folded weight columns
            pl.BlockSpec((1, tc), lambda i, j: (0, j)),   # folded bias columns
        ],
        out_specs=pl.BlockSpec((tb, tc), lambda i, j: (i, j)),
        compiler_params=pltpu.CompilerParams(
            dimension_semantics=("parallel", "parallel")),
    )(x_p, w_p, b_p)

    return out_padded[:B, :C]


def _reference(x, w1, b1, w2, b2):
    return (x @ w1 + b1) @ w2 + b2


if __name__ == "__main__":
    # Small shapes implied by the module: input_length=32, n1=20, num_class=10
    B, input_length, n1, num_class = 8, 32, 20, 10

    key = jax.random.PRNGKey(0)
    kx, kw1, kb1, kw2, kb2 = jax.random.split(key, 5)

    x = jax.random.normal(kx, (B, input_length), dtype=jnp.float32)

    # Deterministic parameter init (PyTorch Linear weight is (out, in);
    # we store the transposed (in, out) form directly).
    w1 = jax.random.normal(kw1, (input_length, n1), dtype=jnp.float32) * 0.1
    b1 = jax.random.normal(kb1, (n1,), dtype=jnp.float32) * 0.1
    w2 = jax.random.normal(kw2, (n1, num_class), dtype=jnp.float32) * 0.1
    b2 = jax.random.normal(kb2, (num_class,), dtype=jnp.float32) * 0.1

    out = classifier_of_vocabulary(x, w1, b1, w2, b2)
    out = jax.block_until_ready(out)

    ref = _reference(x, w1, b1, w2, b2)
    assert out.shape == (B, num_class)
    assert jnp.allclose(out, ref, atol=1e-5, rtol=1e-5), "mismatch vs reference"

    print("KERNEL_OK")
</pallas_src>

<mosaic_0001>
module attributes {stable_mosaic.version = 11 : i64} {
  func.func @_fused_linear_kernel(%arg0: i32, %arg1: i32, %arg2: memref<8x32xf32, #tpu.memory_space<vmem>>, %arg3: memref<32x128xf32, #tpu.memory_space<vmem>>, %arg4: memref<1x128xf32, #tpu.memory_space<vmem>>, %arg5: memref<8x128xf32, #tpu.memory_space<vmem>>) attributes {dimension_semantics = [#tpu.dimension_semantics<parallel>, #tpu.dimension_semantics<parallel>], iteration_bounds = array<i64: 1, 1>, scalar_prefetch = 0 : i64, scratch_operands = 0 : i64, tpu.core_type = #tpu.core_type<tc>, window_params = [{transform_indices = @transform_0, window_bounds = array<i64: 8, 32>}, {transform_indices = @transform_1, window_bounds = array<i64: 32, 128>}, {transform_indices = @transform_2, window_bounds = array<i64: 1, 128>}, {transform_indices = @transform_3, window_bounds = array<i64: 8, 128>}]} {
    %c0 = arith.constant 0 : index
    %c0_0 = arith.constant 0 : index
    %0 = vector.load %arg2[%c0, %c0_0] : memref<8x32xf32, #tpu.memory_space<vmem>>, vector<8x32xf32>
    %c0_1 = arith.constant 0 : index
    %c0_2 = arith.constant 0 : index
    %1 = vector.load %arg3[%c0_1, %c0_2] : memref<32x128xf32, #tpu.memory_space<vmem>>, vector<32x128xf32>
    %cst = arith.constant dense<0.000000e+00> : vector<8x128xf32>
    %2 = tpu.matmul %0, %1, %cst {dimension_numbers = #tpu.dot_dimension_numbers<[1], [0], [0], [1], [0, 0, 1, 1], [], []>} : vector<8x32xf32>, vector<32x128xf32>, vector<8x128xf32> -> vector<8x128xf32>
    %c0_3 = arith.constant 0 : index
    %c0_4 = arith.constant 0 : index
    %3 = vector.load %arg4[%c0_3, %c0_4] : memref<1x128xf32, #tpu.memory_space<vmem>>, vector<1x128xf32>
    %4 = vector.broadcast %3 : vector<1x128xf32> to vector<8x128xf32>
    %5 = arith.addf %2, %4 : vector<8x128xf32>
    %c0_5 = arith.constant 0 : index
    %c0_6 = arith.constant 0 : index
    %6 = vector.load %arg5[%c0_5, %c0_6] : memref<8x128xf32, #tpu.memory_space<vmem>>, vector<8x128xf32>
    tpu.vector_store %arg5[%c0_5, %c0_6], %5 {strides = array<i32>} : memref<8x128xf32, #tpu.memory_space<vmem>>, vector<8x128xf32>,
    return
  }
  func.func @transform_0(%arg0: i32, %arg1: i32) -> (i32, i32) {
    %c0_i32 = arith.constant 0 : i32
    %c0_i32_0 = arith.constant 0 : i32
    return %arg0, %c0_i32 : i32, i32
  }
  func.func @transform_1(%arg0: i32, %arg1: i32) -> (i32, i32) {
    %c0_i32 = arith.constant 0 : i32
    %c0_i32_0 = arith.constant 0 : i32
    return %c0_i32, %arg1 : i32, i32
  }
  func.func @transform_2(%arg0: i32, %arg1: i32) -> (i32, i32) {
    %c0_i32 = arith.constant 0 : i32
    %c0_i32_0 = arith.constant 0 : i32
    return %c0_i32, %arg1 : i32, i32
  }
  func.func @transform_3(%arg0: i32, %arg1: i32) -> (i32, i32) {
    %c0_i32 = arith.constant 0 : i32
    return %arg0, %arg1 : i32, i32
  }
}

</mosaic_0001>

<bundles_post_ra>
// kernel: tpu_custom_call.1
= control target key start
LH: loop header
LB: loop body
LE: loop exit
PB: predicated region body
PF: predicated region fallthrough
CT: control target
= control target key end

     0   :  { %8 = vsyncpa [#allocation3], 0  ;;  %s219_s0 = inlined_call_operand.hbm [shape: f32[8,32], index: 0, kind: input, shape index: {}]   ;;  %s220_s1 = inlined_call_operand.hbm [shape: f32[32,128], index: 1, kind: input, shape index: {}]   ;;  %s221_s2 = inlined_call_operand.vmem [shape: f32[1,128], index: 2, kind: input, shape index: {}]   ;;  %s222_s3 = inlined_call_operand.hbm [shape: f32[8,128], index: 3, kind: output, shape index: {}]  }
   0x1   :  { %9 = vsyncpa [#allocation6], 0 }
   0x2   :  { %10 = vsyncpa [#allocation4], 0  ;;  %s16_s14 = sshll.u32 %s219_s0, 4  ;;  %s182_s15 = smov [#allocation2]   ;;  %s17_s14 = int_to_ptr.hbm [resolvable:$true] %s16_s14 }
   0x3   :  { %s18_s16 = sshll.u32 %s182_s15, 4  ;;  %s26_s19 = sshll.u32 %s220_s1, 4  ;;  %s19_s16 = int_to_ptr.vmem [resolvable:$true] %s18_s16  ;;  %s27_s19 = int_to_ptr.hbm [resolvable:$true] %s26_s19 }
   0x4   :  { %21 = dma.hbm_to_vmem [thread:$0]  %s17_s14, 128, %s19_s16, [#allocation3]  }
   0x5   :  { %s183_s20 = smov [#allocation5]   ;;  %s184_s22 = smov 128  }
   0x6   :  { %s28_s21 = sshll.u32 %s183_s20, 4  ;;  %s185_s23 = smov 8   ;;  %s29_s21 = int_to_ptr.vmem [resolvable:$true] %s28_s21 }
   0x7   :  { %34 = dma.hbm_to_vmem [thread:$0]  %s27_s19, 512, %s29_s21, [#allocation6], %s184_s22, %s184_s22, %s185_s23  }
   0x8   :  { %176 = dma.done.wait [#allocation3], 128  }
   0x9   :  { %177 = vsyncadd [#allocation3], 4294967168 }
   0xa   :  { %178 = dma.done.wait [#allocation6], 512  }
   0xb   :  { %179 = vsyncadd [#allocation6], 4294966784  ;;  %v49_v0 = vld [vmem:[#allocation5 + $0x18] sm:$0xff]  ;;  %v48_v1 = vld [vmem:[#allocation5 + $0x10] sm:$0xff]  ;;  %vm54_vm0 = vcmask 261120   ;;  %s186_s24 = smov [#allocation7]  }
   0xc   :  { %70 = vmatpush.msra.mxu0 %v49_v0  ;;  %v47_v2 = vld [vmem:[#allocation5 + $0x8] sm:$0xff]  ;;  %v46_v3 = vld [vmem:[#allocation5] sm:$0xff]  ;;  %v45_v4 = vld [vmem:[#allocation2] sm:$0xff]  ;;  %s84_s25 = sshll.u32 %s186_s24, 4  ;;  %s86_s28 = sshll.u32 %s222_s3, 4  ;;  %s85_s25 = int_to_ptr.vmem [resolvable:$true] %s84_s25  ;;  %s87_s28 = int_to_ptr.hbm [resolvable:$true] %s86_s28 }
   0xd   :  { %v103_v5 = vld [vmem:[%s221_s2] ss:$0 sm:$0xff] }
   0xe   :  { %71 = vmatpush.msra.mxu0 %v48_v1 }
  0x10   :  { %72 = vmatpush.msra.mxu0 %v47_v2 }
  0x12   :  { %73 = vmatpush.msra.mxu0 %v46_v3 }
  0x13   :  { %97 = vmatmul.msk.f32.vlgmr.msra.gmra.mxu0 %vm54_vm0, %v45_v4 }
  0x90   :  { %v75_v6 = vpop.f32.mrf.mxu0 }
  0x91   :  { %v76_v7 = vadd.f32 %v103_v5, %v75_v6 }
  0x93   :  { %78 = vst [vmem:[#allocation7] sm:$0xff] %v76_v7 }
  0x94   :  { %89 = dma.vmem_to_hbm [thread:$0]  %s85_s25, 128, %s87_s28, [#allocation4]  }
  0x95   :  { %180 = dma.done.wait [#allocation4], 128  }
  0x96   :  { %181 = vsyncadd [#allocation4], 4294967168 }
  0x97   :  { %94 = vsyncpa [#allocation3], 1 }
  0x98   :  { %95 = vsyncpa [#allocation6], 1 }
  0x99   :  { %96 = vsyncpa [#allocation4], 1 }

</bundles_post_ra>
